<compile_context>
chip_gen: v6e
topology: v6e:2x2x1
jax: 0.10.0
libtpu: 0.0.40
codegen_flags: <defaults>
</compile_context>

<pallas_src>
import jax
import jax.numpy as jnp
from jax import lax
from jax.experimental import pallas as pl
from jax.experimental.pallas import tpu as pltpu


def mf_score_kernel(user_ref, v_ref, out_ref):
    # user_ref: [bm, dim]  user block (resident across the item grid when bm == B)
    # v_ref:    [bn, dim]  item-embedding tile, streamed from HBM
    # out_ref:  [bm, bn]   sigmoid scores
    # TODO(synk): if an MLIR dump shows a per-step vxpose of the [bn, dim] tile,
    # store V pre-transposed as [dim, n_item] at init time and switch to an NN dot.
    score = lax.dot_general(
        user_ref[...], v_ref[...],
        dimension_numbers=(((1,), (1,)), ((), ())),   # contract dim axis == user @ V^T
        preferred_element_type=jnp.float32)            # f32 MXU accumulation
    out_ref[...] = jax.nn.sigmoid(score).astype(out_ref.dtype)


def _round_up(x, m):
    return ((x + m - 1) // m) * m


def mf_forward(u_idx, U_emb, V_emb, *, bn=8192, bm=None,
               compute_dtype=jnp.bfloat16, out_dtype=jnp.float32):
    """Forward pass of MF: sigmoid(U_emb[u] @ V_emb.T)."""
    # Embedding gather is plain-JAX glue.
    # TODO(synk): for very large batches, fuse the gather via
    # PrefetchScalarGridSpec(num_scalar_prefetch=1) + pl.Element row gather.
    user = U_emb[u_idx]
    if user.dtype != compute_dtype:
        user = user.astype(compute_dtype)
    # Avoid a per-call HBM pass over V: only cast if it is not already stored
    # in the compute dtype (store the parameter as bf16 at init time).
    V = V_emb if V_emb.dtype == compute_dtype else V_emb.astype(compute_dtype)

    B, dim = user.shape
    n_item = V.shape[0]

    # ---- item tile selection (lane-aligned, large, >=2 tiles when possible) ----
    bn = min(bn, _round_up(n_item, 128))
    bn = max(128, _round_up(bn, 128))
    if pl.cdiv(n_item, bn) < 2 and n_item > 128:
        # Split into (at least) two item tiles so v7x's two TensorCores both
        # get work on small/medium item tables.
        bn = max(128, _round_up(pl.cdiv(n_item, 2), 128))

    # ---- generation-aware VMEM budget ----
    try:
        vmem_cap = int(pltpu.get_tpu_info().vmem_capacity_bytes)
    except Exception:
        vmem_cap = 64 << 20          # conservative fallback: v7x per-TC VMEM
    budget = (vmem_cap * 3) // 4     # headroom for Mosaic internals

    cdt = jnp.dtype(compute_dtype).itemsize
    odt = jnp.dtype(out_dtype).itemsize

    def _footprint(bm_, bn_):
        return (2 * bn_ * dim * cdt        # streamed V tile, double-buffered
                + 2 * bm_ * dim * cdt      # user block (upper bound: double-buffered)
                + 2 * bm_ * bn_ * odt)     # output tile, double-buffered

    # ---- batch tile: keep the whole batch resident while it fits; otherwise
    #      fall back to M-tiling (2-D grid) instead of blowing VMEM ----
    if bm is None:
        bm = B
    bm = min(bm, B)
    while bm > 8 and _footprint(bm, bn) > budget:
        bm = _round_up(bm // 2, 8)
    while bn > 256 and _footprint(bm, bn) > budget:
        bn = max(256, _round_up(bn // 2, 128))
    if bm < B:
        bm = _round_up(bm, 8)        # (8,128) block constraint when tiling batch

    grid = (pl.cdiv(B, bm), pl.cdiv(n_item, bn))

    out = pl.pallas_call(
        mf_score_kernel,
        out_shape=jax.ShapeDtypeStruct((B, n_item), out_dtype),
        grid_spec=pltpu.PrefetchScalarGridSpec(
            num_scalar_prefetch=0,
            grid=grid,                                          # (batch tiles, item tiles)
            in_specs=[
                pl.BlockSpec((bm, dim), lambda i, j: (i, 0)),   # user block (resident per i)
                pl.BlockSpec((bn, dim), lambda i, j: (j, 0)),   # streamed item tile
            ],
            out_specs=pl.BlockSpec((bm, bn), lambda i, j: (i, j)),  # lane-dense output
        ),
        compiler_params=pltpu.CompilerParams(
            dimension_semantics=("parallel", "parallel"),        # megacore splits either axis
            vmem_limit_bytes=int(budget)),
    )(user, V)
    return out


if __name__ == "__main__":
    # Small shapes consistent with the module; n_item deliberately NOT a
    # multiple of 128 to exercise the masked ragged-last-block path, and large
    # enough that the item grid has >= 2 tiles.
    n_user, n_item, dim = 32, 300, 128
    batch = 16

    key = jax.random.PRNGKey(0)
    ku, kv, ki = jax.random.split(key, 3)
    # nn.Embedding default init is N(0, 1).
    U_f32 = jax.random.normal(ku, (n_user, dim), dtype=jnp.float32)
    V_f32 = jax.random.normal(kv, (n_item, dim), dtype=jnp.float32)
    u = jax.random.randint(ki, (batch,), 0, n_user)

    # Parameters stored in the compute dtype once (simulates init-time bf16
    # storage) so the per-call wrapper adds no extra HBM passes over V.
    U_emb = U_f32.astype(jnp.bfloat16)
    V_emb = V_f32.astype(jnp.bfloat16)

    out = jax.block_until_ready(mf_forward(u, U_emb, V_emb))

    assert out.shape == (batch, n_item)
    assert out.dtype == jnp.float32

    # Tight check against a reference using the same bf16-stored parameters
    # (f32 accumulation on both sides).
    user_ref = U_emb[u].astype(jnp.float32)
    V_ref = V_emb.astype(jnp.float32)
    ref_bf = jax.nn.sigmoid(
        jnp.matmul(user_ref, V_ref.T, precision=jax.lax.Precision.HIGHEST))
    assert jnp.allclose(out, ref_bf, atol=1e-4, rtol=1e-4), \
        float(jnp.max(jnp.abs(out - ref_bf)))

    # Loose check against the full-f32 PyTorch-equivalent reference
    # (difference is only bf16 parameter rounding).
    ref_f32 = jax.nn.sigmoid(U_f32[u] @ V_f32.T)
    assert jnp.allclose(out, ref_f32, atol=5e-2, rtol=5e-2)

    print("KERNEL_OK")
</pallas_src>

<mosaic_0001>
module attributes {stable_mosaic.version = 11 : i64} {
  func.func @mf_score_kernel(%arg0: i32, %arg1: i32, %arg2: memref<16x128xbf16, #tpu.memory_space<vmem>>, %arg3: memref<256x128xbf16, #tpu.memory_space<vmem>>, %arg4: memref<16x256xf32, #tpu.memory_space<vmem>>) attributes {dimension_semantics = [#tpu.dimension_semantics<parallel>, #tpu.dimension_semantics<parallel>], iteration_bounds = array<i64: 1, 2>, scalar_prefetch = 0 : i64, scratch_operands = 0 : i64, tpu.core_type = #tpu.core_type<tc>, window_params = [{transform_indices = @transform_0, window_bounds = array<i64: 16, 128>}, {transform_indices = @transform_1, window_bounds = array<i64: 256, 128>}, {transform_indices = @transform_2, window_bounds = array<i64: 16, 256>}]} {
    %c0 = arith.constant 0 : index
    %c0_0 = arith.constant 0 : index
    %0 = vector.load %arg2[%c0, %c0_0] : memref<16x128xbf16, #tpu.memory_space<vmem>>, vector<16x128xbf16>
    %c0_1 = arith.constant 0 : index
    %c0_2 = arith.constant 0 : index
    %1 = vector.load %arg3[%c0_1, %c0_2] : memref<256x128xbf16, #tpu.memory_space<vmem>>, vector<256x128xbf16>
    %cst = arith.constant dense<0.000000e+00> : vector<16x256xf32>
    %2 = tpu.matmul %0, %1, %cst {dimension_numbers = #tpu.dot_dimension_numbers<[1], [1], [0], [0], [0, 0, 1, 0], [], []>} : vector<16x128xbf16>, vector<256x128xbf16>, vector<16x256xf32> -> vector<16x256xf32>
    %3 = arith.negf %2 : vector<16x256xf32>
    %4 = math.exp %3 : vector<16x256xf32>
    %cst_3 = arith.constant 1.000000e+00 : f32
    %5 = vector.broadcast %cst_3 : f32 to vector<16x256xf32>
    %6 = arith.addf %5, %4 : vector<16x256xf32>
    %7 = arith.divf %5, %6 : vector<16x256xf32>
    %c0_4 = arith.constant 0 : index
    %c0_5 = arith.constant 0 : index
    %8 = vector.load %arg4[%c0_4, %c0_5] : memref<16x256xf32, #tpu.memory_space<vmem>>, vector<16x256xf32>
    tpu.vector_store %arg4[%c0_4, %c0_5], %7 {strides = array<i32>} : memref<16x256xf32, #tpu.memory_space<vmem>>, vector<16x256xf32>,
    return
  }
  func.func @transform_0(%arg0: i32, %arg1: i32) -> (i32, i32) {
    %c0_i32 = arith.constant 0 : i32
    %c0_i32_0 = arith.constant 0 : i32
    return %arg0, %c0_i32 : i32, i32
  }
  func.func @transform_1(%arg0: i32, %arg1: i32) -> (i32, i32) {
    %c0_i32 = arith.constant 0 : i32
    %c0_i32_0 = arith.constant 0 : i32
    return %arg1, %c0_i32 : i32, i32
  }
  func.func @transform_2(%arg0: i32, %arg1: i32) -> (i32, i32) {
    %c0_i32 = arith.constant 0 : i32
    return %arg0, %arg1 : i32, i32
  }
}

</mosaic_0001>

<bundles_post_ra>
// kernel: tpu_custom_call.1
= control target key start
LH: loop header
LB: loop body
LE: loop exit
PB: predicated region body
PF: predicated region fallthrough
CT: control target
= control target key end

     0   :  { %7 = vsyncpa [#allocation3], 0  ;;  %s1112_s0 = inlined_call_operand.hbm [shape: bf16[16,128], index: 0, kind: input, shape index: {}]   ;;  %s1113_s1 = inlined_call_operand.hbm [shape: bf16[300,128], index: 1, kind: input, shape index: {}]   ;;  %s1114_s2 = inlined_call_operand.hbm [shape: f32[16,300], index: 2, kind: output, shape index: {}]  }
   0x1   :  { %8 = vsyncpa [#allocation6], 0 }
   0x2   :  { %10 = vsyncpa [#allocation6 + $0x1], 0 }
   0x3   :  { %11 = vsyncpa [#allocation4], 0 }
   0x4   :  { %13 = vsyncpa [#allocation4 + $0x1], 0  ;;  %s883_s9 = smov 0   ;;  %s885_s10 = smov 0  }
   0x5   :  { %s887_s11 = smov 0   ;;  %s889_s12 = smov 0  }
   0x6   :  { %s891_s13 = smov 0   ;;  %s893_s14 = smov 0  }
   0x7 LB: > { %s547_s15 = sadd.s32 4294967295, %s857_s14   ;;  %s548_s16 = sadd.s32 4294967294, %s857_s14   ;;  %s857_s14 = sphi %s893_s14, %s19_s14   ;;  %s853_s13 = sphi %s891_s13, %s1129_s13   ;;  %s849_s12 = sphi %s889_s12, %s1128_s12   ;;  %s845_s11 = sphi %s887_s11, %s1127_s11   ;;  %s841_s10 = sphi %s885_s10, %s1126_s10   ;;  %s837_s9 = sphi %s883_s9, %s1125_s9  }
   0x8   : > { %s28_s17 = sadd.s32 1, %s853_s13  ;;  %s64_s18 = sadd.s32 1, %s845_s11 }
   0x9   : > { %p29_p0 = scmp.ge.s32.totalorder %s28_s17, 2  ;;  %p71_p1 = scmp.ne.s32.totalorder %s845_s11, %s841_s10 }
   0xa   : > { %p72_p2 = scmp.eq.s32.totalorder %s857_s14, 0  ;;  %p77_p3 = scmp.ne.s32.totalorder %s841_s10, %s837_s9 }
   0xb   : > { %s1131_s17 = smov (%p29_p0, %s28_s17), 0  ;;  %p928_p5 = scmp.eq.s32.totalorder %s547_s15, 0 }
   0xc   : > { %p924_p4 = por %p72_p2, %p71_p1  ;;  %s61_s21 = ssub.s32 %s853_s13, %s1131_s17 }
   0xd   : > { %p103_p6 = scmp.eq.s32.totalorder %s547_s15, 1  ;;  %p62_p7 = scmp.eq.s32.totalorder %s61_s21, 0 }
   0xe   : > { %p936_p8 = por %p928_p5, %p77_p3  ;;  %p109_p10 = scmp.eq.s32.totalorder %s548_s16, 1 }
   0xf   : > { %p940_p9 = por %p103_p6, %p71_p1  ;;  %p549_p12 = scmp.ge.s32.totalorder %s857_s14, 1 }
  0x10   : > { %s1118_s22 = scalar_select %p936_p8, 1, 0 }
  0x11   : > { %s1119_s23 = scalar_select %p940_p9, 1, 0 }
  0x12   : > { %s945_s24 = scalar_select %p62_p7, %s845_s11, %s64_s18  }
  0x13   : > { %p947_p11 = por %p109_p10, %p77_p3  ;;  %p116_p13 = scmp.lt.s32.totalorder %s857_s14, 3 }
  0x14   : > { %s859_s27 = smov [#allocation2]  }
  0x15   : > { %s1120_s25 = scalar_select %p947_p11, 1, 0 }
  0x16   : > { %p953_p0 = pnand %p549_p12, %p116_p13  ;;  %s131_s28 = sshll.u32 %s859_s27, 4  ;;  %s132_s28 = int_to_ptr.vmem [resolvable:$true] %s131_s28 }
  0x17   : > { %s732_s29 = scalar_lea.vmem %s132_s28, 128  ;;  %p740_p11 = scmp.lt.s32.totalorder %s132_s28, %s132_s28 }
  0x18   : > { %p622_p1 = pneg %p953_p0  ;;  %p733_p3 = scmp.ne.s32.totalorder %s132_s28, %s732_s29 }
  0x19   : > { %p741_p9 = scmp.lt.s32.totalorder %s732_s29, %s732_s29 }
  0x1a   : > { %p623_p2 = pnand %p622_p1, %p928_p5 }
  0x1b   : > { %p742_p8 = por %p741_p9, %p740_p11 }
  0x1c   : > { %p723_p6 = pneg %p623_p2 }
  0x1e   : > { %p735_p7 = pnand %p733_p3, %p723_p6 }
  0x20   : > { %p736_p10 = pneg %p735_p7 }
  0x22   : > { %p743_p12 = pnand %p742_p8, %p736_p10 }
  0x24   : > { %746 = shalt.err (!%p743_p12)
}
  0x25   : > { %s860_s30 = smov 64   ;;  %s861_s3 = smov 4  }
  0x26   : > { %625 = dma.hbm_to_vmem [thread:$0]  (!%p623_p2), %s1112_s0, 128, %s132_s28, [#allocation3], %s860_s30, %s860_s30, %s861_s3  }
  0x27   : > { %p551_p13 = scmp.ge.s32.totalorder %s857_s14, 2 }
  0x29   : > { %141 = sbr.rel (%p551_p13) target bundleno = 78 (0x4e), region = 20 }
  0x2e   : > { %144 = sbr.rel (!%p924_p4) target bundleno = 78 (0x4e), region = 24  ;;  %s145_s6 = sand.u32 (%p924_p4), 1, %s845_s11  }
  0x2f   : > { %s553_s7 = sshll.u32 (%p924_p4), %s853_s13, 5  ;;  %s552_s8 = sshll.u32 (%p924_p4), %s145_s6, 7 }
  0x30   : > { %s151_s15 = ssub.s32 (%p924_p4), 38, %s553_s7  ;;  %s974_s21 = scalar_lea.sflag (%p924_p4), [#allocation6], %s145_s6 }
  0x31   : > { %p152_p8 = scmp.lt.s32.totalorder (%p924_p4), %s151_s15, 32  ;;  %s149_s27 = scalar_lea.vmem (%p924_p4), [#allocation5], %s552_s8 }
  0x33   : > { %s1133_s15 = smov (!%p152_p8, %s151_s15), 32 }
  0x34   : > { %s971_s16 = sshll.u32 %s1133_s15, 6 }
  0x35   : > { %s156_s18 = ssub.s32 2048, %s971_s16 }
  0x36   : > { %157 = vsyncadd %s974_s21, %s156_s18  ;;  %p555_p4 = scmp.ne.s32.totalorder %s971_s16, 0  ;;  %s594_s19 = sshll.u32 %s853_s13, 11 }
  0x37   : > { %s982_s30 = scalar_lea.hbm %s1113_s1, %s594_s19  ;;  %s162_s3 = sshll.u32 %s149_s27, 4  ;;  %s984_s3 = int_to_ptr.vmem [resolvable:$true] %s162_s3 }
  0x38   : > { %s747_s4 = scalar_lea.hbm %s982_s30, %s971_s16  ;;  %s751_s7 = scalar_lea.hbm %s1113_s1, 2432 }
  0x39   : > { %p748_p9 = scmp.ne.s32.totalorder %s982_s30, %s747_s4  ;;  %p753_p2 = scmp.lt.s32.totalorder %s751_s7, %s747_s4 }
  0x3b   : > { %p749_p11 = pnand %p748_p9, %p555_p4 }
  0x3d   : > { %p750_p1 = pneg %p749_p11 }
  0x3f   : > { %p755_p6 = pnand %p753_p2, %p750_p1 }
  0x41   : > { %758 = shalt.err (!%p755_p6)
}
  0x42   : > { %s759_s8 = scalar_lea.vmem %s984_s3, %s971_s16  ;;  %s862_s15 = smov [#allocation5]  }
  0x43   : > { %p760_p3 = scmp.ne.s32.totalorder %s984_s3, %s759_s8  ;;  %s763_s18 = sshll.u32 %s862_s15, 4  ;;  %s764_s18 = int_to_ptr.vmem [resolvable:$false] %s763_s18 }
  0x44   : > { %s765_s27 = scalar_lea.vmem %s764_s18, 4096  ;;  %p766_p12 = scmp.lt.s32.totalorder %s984_s3, %s764_s18 }
  0x45   : > { %p761_p7 = pnand %p760_p3, %p555_p4  ;;  %p767_p8 = scmp.lt.s32.totalorder %s765_s27, %s759_s8 }
  0x47   : > { %p762_p10 = pneg %p761_p7  ;;  %p768_p9 = por %p767_p8, %p766_p12 }
  0x49   : > { %p769_p11 = pnand %p768_p9, %p762_p10 }
  0x4b   : > { %772 = shalt.err (!%p769_p11)
}
  0x4c   : > { %s863_s19 = smov 64   ;;  %s864_s28 = smov 4  }
  0x4d   : > { %168 = dma.hbm_to_vmem [thread:$0]  (%p555_p4), %s982_s30, %s971_s16, %s984_s3, %s974_s21, %s863_s19, %s863_s19, %s864_s28  }
  0x4e PF: > { %174 = sbr.rel (%p953_p0) target bundleno = 413 (0x19d), region = 28 }
  0x53   : > { %824 = dma.done.wait (%p928_p5), [#allocation3], 128  }
  0x54   : > { %826 = vsyncadd (%p928_p5), [#allocation3], 4294967168  ;;  %s1013_s29 = sand.u32 1, %s841_s10   ;;  %p1122_p4 = scmp.ne.s32.totalorder %s1118_s22, 0 }
  0x55   : > { %s561_s4 = sshll.u32 %s1013_s29, 7  ;;  %s181_s5 = scalar_lea.sflag [#allocation6], %s1013_s29 }
  0x56   : > { %s1017_s16 = scalar_lea.vmem [#allocation5], %s561_s4 }
  0x57   : > { %828 = dma.done.wait (%p1122_p4), %s181_s5, 2048  }
  0x58   : > { %830 = vsyncadd (%p1122_p4), %s181_s5, 4294965248  ;;  %v688_v0 = vld [vmem:[%s1017_s16 + $0x78] sm:$0xff]   ;;  %v690_v2 = vld [vmem:[%s1017_s16 + $0x70] sm:$0xff]   ;;  %s562_s20 = sshll.u32 %s1013_s29, 5  ;;  %s426_s26 = scalar_lea.sflag [#allocation4], %s1013_s29 }
  0x59   : > { %v689_v1 = vld [vmem:[%s1017_s16 + $0x38] sm:$0xff]   ;;  %598 = vmatprep.subr.bf16.mxu0 %v688_v0  ;;  %v691_v3 = vld [vmem:[%s1017_s16 + $0x30] sm:$0xff]   ;;  %v692_v4 = vld [vmem:[%s1017_s16 + $0x68] sm:$0xff]   ;;  %s204_s22 = scalar_lea.vmem [#allocation7], %s562_s20  ;;  %p1123_p5 = scmp.ne.s32.totalorder %s1119_s23, 0 }
  0x5a   : > { %599 = vmatpush3.bf16.xpose.msra.mxu0 %v689_v1  ;;  %v693_v5 = vld [vmem:[%s1017_s16 + $0x28] sm:$0xff]   ;;  %v694_v6 = vld [vmem:[%s1017_s16 + $0x60] sm:$0xff]   ;;  %v704_v7 = vld [vmem:[#allocation2] sm:$0xff]   ;;  %s585_s21 = sshll.u32 (%p1123_p5), %s849_s12, 1 }
  0x5b   : > { %600 = vmatprep.subr.bf16.mxu0 %v690_v2  ;;  %614 = vmatprep.mubr.bf16.mxu0 %v704_v7  ;;  %v695_v8 = vld [vmem:[%s1017_s16 + $0x20] sm:$0xff]   ;;  %v696_v9 = vld [vmem:[%s1017_s16 + $0x58] sm:$0xff]   ;;  %v698_v11 = vld [vmem:[%s1017_s16 + $0x50] sm:$0xff]   ;;  %s435_s30 = ssub.s32 (%p1123_p5), 3, %s585_s21 }
  0x5c   : > { %v697_v10 = vld [vmem:[%s1017_s16 + $0x18] sm:$0xff]   ;;  %v699_v12 = vld [vmem:[%s1017_s16 + $0x10] sm:$0xff]   ;;  %v700_v13 = vld [vmem:[%s1017_s16 + $0x48] sm:$0xff]   ;;  %p436_p0 = scmp.lt.s32.totalorder (%p1123_p5), %s435_s30, 2 }
  0x5d   : > { %v701_v14 = vld [vmem:[%s1017_s16 + $0x8] sm:$0xff]   ;;  %v702_v15 = vld [vmem:[%s1017_s16 + $0x40] sm:$0xff]  }
  0x5e   : > { %v703_v16 = vld [vmem:[%s1017_s16] sm:$0xff]  }
  0x62   : > { %601 = vmatpush3.bf16.xpose.msra.mxu0 %v691_v3 }
  0x63   : > { %602 = vmatprep.subr.bf16.mxu0 %v692_v4 }
  0x6a   : > { %603 = vmatpush3.bf16.xpose.msra.mxu0 %v693_v5 }
  0x6b   : > { %604 = vmatprep.subr.bf16.mxu0 %v694_v6 }
  0x72   : > { %605 = vmatpush3.bf16.xpose.msra.mxu0 %v695_v8 }
  0x73   : > { %606 = vmatprep.subr.bf16.mxu0 %v696_v9 }
  0x7a   : > { %607 = vmatpush3.bf16.xpose.msra.mxu0 %v697_v10 }
  0x7b   : > { %608 = vmatprep.subr.bf16.mxu0 %v698_v11 }
  0x82   : > { %609 = vmatpush3.bf16.xpose.msra.mxu0 %v699_v12 }
  0x83   : > { %610 = vmatprep.subr.bf16.mxu0 %v700_v13 }
  0x8a   : > { %611 = vmatpush3.bf16.xpose.msra.mxu0 %v701_v14 }
  0x8b   : > { %612 = vmatprep.subr.bf16.mxu0 %v702_v15 }
  0x92   : > { %613 = vmatpush3.bf16.xpose.msra.mxu0 %v703_v16 }
  0x99   : > { %615 = vmatmul.mubr.bf16.vlgmr.msra.gmra.mxu0 %v704_v7 }
 0x159   : > { %v388_v17 = vpop.f32.mrf.mxu0 }
 0x15a   : > { %v580_v18 = vmul.f32 -1.442695, %v388_v17 }
 0x15b   : > { %v390_v19 = vpop.f32.mrf.mxu0 }
 0x15c   : > { %705 = vpow2.f32 %v580_v18  ;;  %v581_v20 = vmul.f32 -1.442695, %v390_v19 }
 0x15d   : > { %v392_v21 = vpop.f32.mrf.mxu0 }
 0x15e   : > { %707 = vpow2.f32 %v581_v20  ;;  %v582_v22 = vmul.f32 -1.442695, %v392_v21 }
 0x15f   : > { %v394_v23 = vpop.f32.mrf.mxu0 }
 0x160   : > { %709 = vpow2.f32 %v582_v22  ;;  %v583_v24 = vmul.f32 -1.442695, %v394_v23 }
 0x162   : > { %711 = vpow2.f32 %v583_v24 }
 0x169   : > { %v706_v25 = vpop.eup %705 }
 0x16a   : > { %v409_v26 = vadd.f32 1.0, %v706_v25 }
 0x16b   : > { %v708_v27 = vpop.eup %707 }
 0x16c   : > { %713 = vrcp.f32 %v409_v26  ;;  %v410_v28 = vadd.f32 1.0, %v708_v27 }
 0x16d   : > { %v710_v29 = vpop.eup %709 }
 0x16e   : > { %715 = vrcp.f32 %v410_v28  ;;  %v411_v30 = vadd.f32 1.0, %v710_v29 }
 0x16f   : > { %v712_v31 = vpop.eup %711 }
 0x170   : > { %717 = vrcp.f32 %v411_v30  ;;  %v412_v32 = vadd.f32 1.0, %v712_v31 }
 0x172   : > { %719 = vrcp.f32 %v412_v32 }
 0x179   : > { %v714_v33 = vpop.eup %713 }
 0x17a   : > { %421 = vst [vmem:[%s204_s22] sm:$0xff] %v714_v33 }
 0x17b   : > { %v716_v34 = vpop.eup %715 }
 0x17c   : > { %422 = vst [vmem:[%s204_s22 + $0x8] sm:$0xff] %v716_v34  ;;  %432 = sbr.rel (!%p1123_p5) target bundleno = 413 (0x19d), region = 40 }
 0x17d   : > { %v718_v35 = vpop.eup %717 }
 0x17e   : > { %423 = vst [vmem:[%s204_s22 + $0x10] sm:$0xff] %v718_v35 }
 0x17f   : > { %v720_v36 = vpop.eup %719 }
 0x180   : > { %424 = vst [vmem:[%s204_s22 + $0x18] sm:$0xff] %v720_v36 }
 0x181   : > { %s1135_s30 = smov (!%p436_p0, %s435_s30), 2 }
 0x182   : > { %s1047_s3 = sshll.u32 %s1135_s30, 8 }
 0x183   : > { %s440_s6 = ssub.s32 512, %s1047_s3 }
 0x184   : > { %441 = vsyncadd %s426_s26, %s440_s6  ;;  %p587_p1 = scmp.ne.s32.totalorder %s1047_s3, 0  ;;  %s595_s23 = sshll.u32 %s849_s12, 8 }
 0x185   : > { %s1057_s15 = scalar_lea.hbm %s1114_s2, %s595_s23  ;;  %s589_s18 = sshll.u32 %s1135_s30, 3 }
 0x186   : > { %s449_s27 = sshll.u32 %s204_s22, 4  ;;  %s865_s28 = smov [#allocation7]   ;;  %s1060_s27 = int_to_ptr.vmem [resolvable:$true] %s449_s27 }
 0x187   : > { %s773_s19 = scalar_lea.vmem %s1060_s27, %s1047_s3  ;;  %s777_s4 = sshll.u32 %s865_s28, 4  ;;  %s778_s4 = int_to_ptr.vmem [resolvable:$false] %s777_s4 }
 0x188   : > { %p774_p2 = scmp.ne.s32.totalorder %s1060_s27, %s773_s19  ;;  %s779_s12 = scalar_lea.vmem %s778_s4, 1024 }
 0x189   : > { %p780_p7 = scmp.lt.s32.totalorder %s1060_s27, %s778_s4  ;;  %p781_p10 = scmp.lt.s32.totalorder %s779_s12, %s773_s19 }
 0x18a   : > { %p775_p6 = pnand %p774_p2, %p587_p1 }
 0x18b   : > { %p782_p12 = por %p781_p10, %p780_p7 }
 0x18c   : > { %p776_p3 = pneg %p775_p6 }
 0x18e   : > { %p783_p8 = pnand %p782_p12, %p776_p3 }
 0x190   : > { %786 = shalt.err (!%p783_p8)
}
 0x191   : > { %s787_s5 = scalar_lea.hbm %s1057_s15, %s1047_s3  ;;  %s791_s22 = scalar_lea.hbm %s1114_s2, 768 }
 0x192   : > { %p788_p9 = scmp.ne.s32.totalorder %s1057_s15, %s787_s5  ;;  %p792_p5 = scmp.lt.s32.totalorder %s1057_s15, %s1114_s2 }
 0x193   : > { %p793_p0 = scmp.lt.s32.totalorder %s791_s22, %s787_s5 }
 0x194   : > { %p789_p11 = pnand %p788_p9, %p587_p1 }
 0x195   : > { %p794_p2 = por %p793_p0, %p792_p5 }
 0x196   : > { %p790_p4 = pneg %p789_p11 }
 0x198   : > { %p795_p6 = pnand %p794_p2, %p790_p4 }
 0x19a   : > { %798 = shalt.err (!%p795_p6)
}
 0x19b   : > { %s866_s23 = smov 256   ;;  %s867_s7 = smov 384  }
 0x19c   : > { %455 = dma.vmem_to_hbm [thread:$0]  (%p587_p1), %s1060_s27, %s1047_s3, %s1057_s15, %s426_s26, %s866_s23, %s867_s7, %s589_s18  }
 0x19d PF: > { %s464_s8 = sand.u32 1, %s837_s9   ;;  %p1124_p3 = scmp.ne.s32.totalorder %s1120_s25, 0 }
 0x19e   : > { %s465_s19 = scalar_lea.sflag [#allocation4], %s464_s8 }
 0x19f   : > { %p627_p7 = pnand %p551_p13, %p1124_p3 }
 0x1a1   : > { %p628_p10 = pneg %p627_p7 }
 0x1a3   : > { %832 = dma.done.wait (%p628_p10), %s465_s19, 512  }
 0x1a4   : > { %834 = vsyncadd (%p628_p10), %s465_s19, 4294966784  ;;  %s19_s14 = sadd.s32 1, %s857_s14   ;;  %s1125_s9 = smov %s841_s10 }
 0x1a5   : > { %p16_p12 = scmp.ge.s32.totalorder %s19_s14, 4   ;;  %s1126_s10 = smov %s845_s11 }
 0x1a6   : > { %s1127_s11 = smov %s945_s24  ;;  %s1128_s12 = smov %s853_s13 }
 0x1a7   : > { %s1129_s13 = smov %s1131_s17  ;;  %18 = sbr.rel (!%p16_p12) target bundleno = 7 (0x7), region = 79 }
 0x1ac   :  { %470 = vsyncpa [#allocation3], 1 }
 0x1ad   :  { %472 = vsyncpa [#allocation3 + $0x1], 1 }
 0x1ae   :  { %473 = vsyncpa [#allocation6], 1 }
 0x1af   :  { %475 = vsyncpa [#allocation6 + $0x1], 1 }
 0x1b0   :  { %476 = vsyncpa [#allocation4], 1 }
 0x1b1   :  { %478 = vsyncpa [#allocation4 + $0x1], 1 }

</bundles_post_ra>
